<compile_context>
chip_gen: v7x
topology: tpu7x:2x2x1
jax: 0.10.0
libtpu: 0.0.40
codegen_flags: <defaults>
</compile_context>

<pallas_src>
import jax
import jax.numpy as jnp
from jax.experimental import pallas as pl
from jax.experimental.pallas import tpu as pltpu


def _round_up(n, m):
    return ((n + m - 1) // m) * m


def _fused_linear_kernel(x_ref, zb_ref, w_ref, ub_ref, o_ref):
    """o = x @ (W1@W2)  +  [Z | 1 | 0pad] @ [[U]; [b1@W2 + b2]; [0pad]]  (two MXU dots)."""
    acc = jnp.dot(x_ref[...], w_ref[...], preferred_element_type=jnp.float32)
    acc = acc + jnp.dot(zb_ref[...], ub_ref[...], preferred_element_type=jnp.float32)
    o_ref[...] = acc.astype(o_ref.dtype)


def fuse_params(params, compute_dtype=jnp.bfloat16):
    """One-time weight fold, hoisted out of the per-call path.

    Valid because dropout(0.5) is identity in eval mode:
      fc2(dropout(fc1(x))) + Z @ U == x @ (W1@W2) + [Z|1] @ [[U];[b1@W2 + b2]].
    Ub's contraction dim is padded to a multiple of 16 so both the f32 (8,128) and
    bf16 (16,128) native sublane tilings are matched (negligible extra bytes).
    """
    w1, b1, w2, b2, u = params              # w1/w2 pre-transposed to (in, out); b*: (1, out)
    G, O = u.shape
    W = jnp.dot(w1, w2, preferred_element_type=jnp.float32)           # (K_in, O)
    b = jnp.dot(b1, w2, preferred_element_type=jnp.float32) + b2      # (1, O)
    gp_pad = _round_up(G + 1, 16)
    Ub = jnp.concatenate(
        [u, b, jnp.zeros((gp_pad - G - 1, O), jnp.float32)], axis=0)  # (gp_pad, O)
    return W.astype(compute_dtype), Ub.astype(compute_dtype)


def linear_model_forward(x, Z, fused, *, out_dtype=jnp.float32, tm_target=512):
    """x: (B, input_size), Z: (B, group_number) -> (B, output_size) in out_dtype."""
    W, Ub = fused
    cdt = W.dtype
    B, K_in = x.shape
    G = Z.shape[1]
    Gp, O = Ub.shape                        # Gp = round_up(G + 1, 16)

    # ---- batch tiling: sublane-aligned, cdiv grid (at most one remainder tile) ----
    B_pad = _round_up(B, 8)
    tm = min(_round_up(tm_target, 8), B_pad)
    if B_pad >= 16:
        # at least 2 batch tiles when the batch allows it: feeds both v7x TensorCores
        tm = min(tm, _round_up(-(-B_pad // 2), 8))

    in_isz = W.dtype.itemsize
    out_isz = jnp.dtype(out_dtype).itemsize

    def vmem_need(t):
        w_b = 2 * (K_in + Gp) * O * in_isz          # resident weights (pipeline double-buffers)
        a_b = 2 * t * (K_in + Gp) * in_isz          # x + Zb tiles (double-buffered)
        o_b = 2 * t * O * out_isz                   # output tiles
        return w_b + a_b + o_b

    VMEM_BUDGET = 40 * 1024 * 1024                  # fits v7x's 64 MiB physical VMEM w/ headroom
    while tm > 8 and vmem_need(tm) > VMEM_BUDGET:
        tm = max(8, _round_up(tm // 2, 8))
    # TODO(synk): if the fused weight alone exceeds the budget (huge K_in/O), single-buffer
    #             the constant-index weight blocks (pipeline_mode=pl.Buffered(1)) and/or add
    #             a K-reduction grid axis marked "arbitrary" with a VMEM f32 accumulator.

    n_tiles = pl.cdiv(B_pad, tm)
    vmem_limit = int(min(48 * 1024 * 1024,
                         max(32 * 1024 * 1024, vmem_need(tm) + 4 * 1024 * 1024)))

    # ---- per-call activation prep (only the tiny Z stream is rebuilt; x is just cast) ----
    x_c = x.astype(cdt)
    Zb = jnp.concatenate(
        [Z.astype(cdt), jnp.ones((B, 1), cdt), jnp.zeros((B, Gp - G - 1), cdt)], axis=1)
    if B_pad != B:
        x_c = jnp.pad(x_c, ((0, B_pad - B), (0, 0)))
        Zb = jnp.pad(Zb, ((0, B_pad - B), (0, 0)))

    flops = 2 * B_pad * O * (K_in + Gp)
    bytes_accessed = (x_c.size * in_isz + Zb.size * in_isz
                      + (K_in + Gp) * O * in_isz + B_pad * O * out_isz)

    out = pl.pallas_call(
        _fused_linear_kernel,
        out_shape=jax.ShapeDtypeStruct((B_pad, O), out_dtype),
        grid=(n_tiles,),
        in_specs=[
            pl.BlockSpec((tm, K_in), lambda i: (i, 0)),   # x tile (no lane padding)
            pl.BlockSpec((tm, Gp), lambda i: (i, 0)),     # [Z | 1 | 0] tile
            # Constant-index weights: same block every grid step -> not re-fetched.
            pl.BlockSpec((K_in, O), lambda i: (0, 0)),    # W1 @ W2
            pl.BlockSpec((Gp, O), lambda i: (0, 0)),      # [U ; b1@W2 + b2 ; 0]
        ],
        out_specs=pl.BlockSpec((tm, O), lambda i: (i, 0)),
        compiler_params=pltpu.CompilerParams(
            dimension_semantics=("parallel",),            # batch tiles across TCs on v7x
            vmem_limit_bytes=vmem_limit,
        ),
        cost_estimate=pl.CostEstimate(
            flops=flops, transcendentals=0, bytes_accessed=bytes_accessed),
    )(x_c, Zb, W, Ub)

    return out if B_pad == B else out[:B]


def init_params(key, input_size, output_size, group_number, num_random_effects):
    """Deterministic synthetic parameters (PyTorch nn.Linear-style uniform init)."""
    k1, k2, k3, k4, k5 = jax.random.split(key, 5)
    lim1 = 1.0 / jnp.sqrt(input_size)
    lim2 = 1.0 / jnp.sqrt(input_size)   # fc2 is also declared with in_features=input_size
    # Pre-transposed to (in, out) for the kernel.
    w1 = jax.random.uniform(k1, (input_size, output_size), jnp.float32, -lim1, lim1)
    b1 = jax.random.uniform(k2, (1, output_size), jnp.float32, -lim1, lim1)
    w2 = jax.random.uniform(k3, (input_size, output_size), jnp.float32, -lim2, lim2)
    b2 = jax.random.uniform(k4, (1, output_size), jnp.float32, -lim2, lim2)
    u = jax.random.normal(k5, (group_number, num_random_effects), jnp.float32) * 0.1
    return (w1, b1, w2, b2, u)


if __name__ == "__main__":
    # Small shapes consistent with the module's forward:
    # input_size == output_size so fc2(fc1(x)) type-checks;
    # num_random_effects == output_size so the residual add is exact.
    batch = 8
    input_size = 32
    output_size = 32
    group_number = 4
    num_random_effects = output_size

    key = jax.random.PRNGKey(0)
    kx, kz, kp = jax.random.split(key, 3)

    x = jax.random.normal(kx, (batch, input_size), jnp.float32)
    # Z: one-hot group design matrix (batch, group_number)
    groups = jax.random.randint(kz, (batch,), 0, group_number)
    Z = jax.nn.one_hot(groups, group_number, dtype=jnp.float32)

    params = init_params(kp, input_size, output_size, group_number, num_random_effects)

    # One-time weight fold, hoisted out of the per-call path.
    fused_f32 = fuse_params(params, jnp.float32)     # exactness path
    fused_bf16 = fuse_params(params, jnp.bfloat16)   # bf16 operands, f32 MXU accumulation

    fwd = jax.jit(linear_model_forward, static_argnames=("out_dtype", "tm_target"))

    out_f32 = fwd(x, Z, fused_f32)                               # f32 in / f32 out
    out_bf16 = fwd(x, Z, fused_bf16, out_dtype=jnp.bfloat16)     # bf16 in / bf16 out
    jax.block_until_ready((out_f32, out_bf16))

    # Pure-JAX reference of the ORIGINAL (unfused) forward, dropout in eval mode.
    w1, b1, w2, b2, u = params
    ref = (x @ w1 + b1) @ w2 + b2 + Z @ u

    assert out_f32.shape == (batch, output_size)
    assert out_bf16.shape == (batch, output_size)
    assert jnp.allclose(out_f32, ref, atol=1e-5, rtol=1e-5)
    assert jnp.allclose(out_bf16.astype(jnp.float32), ref, atol=3e-2, rtol=3e-2)

    print("KERNEL_OK")
</pallas_src>

<mosaic_0001>
module attributes {stable_mosaic.version = 11 : i64} {
  func.func @_fused_linear_kernel(%arg0: i32, %arg1: memref<8x32xf32, #tpu.memory_space<vmem>>, %arg2: memref<8x16xf32, #tpu.memory_space<vmem>>, %arg3: memref<32x32xf32, #tpu.memory_space<vmem>>, %arg4: memref<16x32xf32, #tpu.memory_space<vmem>>, %arg5: memref<8x32xf32, #tpu.memory_space<vmem>>) attributes {dimension_semantics = [#tpu.dimension_semantics<parallel>], iteration_bounds = array<i64: 1>, scalar_prefetch = 0 : i64, scratch_operands = 0 : i64, tpu.core_type = #tpu.core_type<tc>, window_params = [{transform_indices = @transform_0, window_bounds = array<i64: 8, 32>}, {transform_indices = @transform_1, window_bounds = array<i64: 8, 16>}, {pipeline_mode = #tpu.pipeline_mode<synchronous>, transform_indices = @transform_2, window_bounds = array<i64: 32, 32>}, {pipeline_mode = #tpu.pipeline_mode<synchronous>, transform_indices = @transform_3, window_bounds = array<i64: 16, 32>}, {transform_indices = @transform_4, window_bounds = array<i64: 8, 32>}]} {
    %c0 = arith.constant 0 : index
    %c0_0 = arith.constant 0 : index
    %0 = vector.load %arg1[%c0, %c0_0] : memref<8x32xf32, #tpu.memory_space<vmem>>, vector<8x32xf32>
    %c0_1 = arith.constant 0 : index
    %c0_2 = arith.constant 0 : index
    %1 = vector.load %arg3[%c0_1, %c0_2] : memref<32x32xf32, #tpu.memory_space<vmem>>, vector<32x32xf32>
    %cst = arith.constant dense<0.000000e+00> : vector<8x32xf32>
    %2 = tpu.matmul %0, %1, %cst {dimension_numbers = #tpu.dot_dimension_numbers<[1], [0], [0], [1], [0, 0, 1, 1], [], []>} : vector<8x32xf32>, vector<32x32xf32>, vector<8x32xf32> -> vector<8x32xf32>
    %c0_3 = arith.constant 0 : index
    %c0_4 = arith.constant 0 : index
    %3 = vector.load %arg2[%c0_3, %c0_4] : memref<8x16xf32, #tpu.memory_space<vmem>>, vector<8x16xf32>
    %c0_5 = arith.constant 0 : index
    %c0_6 = arith.constant 0 : index
    %4 = vector.load %arg4[%c0_5, %c0_6] : memref<16x32xf32, #tpu.memory_space<vmem>>, vector<16x32xf32>
    %cst_7 = arith.constant dense<0.000000e+00> : vector<8x32xf32>
    %5 = tpu.matmul %3, %4, %cst_7 {dimension_numbers = #tpu.dot_dimension_numbers<[1], [0], [0], [1], [0, 0, 1, 1], [], []>} : vector<8x16xf32>, vector<16x32xf32>, vector<8x32xf32> -> vector<8x32xf32>
    %6 = arith.addf %2, %5 : vector<8x32xf32>
    %c0_8 = arith.constant 0 : index
    %c0_9 = arith.constant 0 : index
    %7 = vector.load %arg5[%c0_8, %c0_9] : memref<8x32xf32, #tpu.memory_space<vmem>>, vector<8x32xf32>
    tpu.vector_store %arg5[%c0_8, %c0_9], %6 {strides = array<i32>} : memref<8x32xf32, #tpu.memory_space<vmem>>, vector<8x32xf32>,
    return
  }
  func.func @transform_0(%arg0: i32) -> (i32, i32) {
    %c0_i32 = arith.constant 0 : i32
    %c0_i32_0 = arith.constant 0 : i32
    return %arg0, %c0_i32 : i32, i32
  }
  func.func @transform_1(%arg0: i32) -> (i32, i32) {
    %c0_i32 = arith.constant 0 : i32
    %c0_i32_0 = arith.constant 0 : i32
    return %arg0, %c0_i32 : i32, i32
  }
  func.func @transform_2(%arg0: i32) -> (i32, i32) {
    %c0_i32 = arith.constant 0 : i32
    %c0_i32_0 = arith.constant 0 : i32
    %c0_i32_1 = arith.constant 0 : i32
    return %c0_i32, %c0_i32_0 : i32, i32
  }
  func.func @transform_3(%arg0: i32) -> (i32, i32) {
    %c0_i32 = arith.constant 0 : i32
    %c0_i32_0 = arith.constant 0 : i32
    %c0_i32_1 = arith.constant 0 : i32
    return %c0_i32, %c0_i32_0 : i32, i32
  }
  func.func @transform_4(%arg0: i32) -> (i32, i32) {
    %c0_i32 = arith.constant 0 : i32
    %c0_i32_0 = arith.constant 0 : i32
    return %arg0, %c0_i32 : i32, i32
  }
}

</mosaic_0001>

<bundles_post_ra>
// kernel: linear_model_forward.1
= control target key start
LH: loop header
LB: loop body
LE: loop exit
PB: predicated region body
PF: predicated region fallthrough
CT: control target
= control target key end

     0   :  { %9 = vsyncpa [#allocation3], 0  ;;  %s368_s0 = inlined_call_operand.hbm [shape: f32[8,32], index: 0, kind: input, shape index: {}]   ;;  %s369_s1 = inlined_call_operand.vmem [shape: f32[8,16], index: 1, kind: input, shape index: {}]   ;;  %s370_s2 = inlined_call_operand.vmem [shape: f32[32,32], index: 2, kind: input, shape index: {}]   ;;  %s371_s3 = inlined_call_operand.vmem [shape: f32[16,32], index: 3, kind: input, shape index: {}]   ;;  %s372_s4 = inlined_call_operand.hbm [shape: f32[8,32], index: 4, kind: output, shape index: {}]  }
   0x1   :  { %10 = vsyncpa [#allocation4], 0  ;;  %s293_s15 = smov [#allocation2]   ;;  %s245_s19 = scalar_lea.hbm %s368_s0, 128 }
   0x2   :  { %s17_s16 = sshll.u32 %s293_s15, 4  ;;  %p246_p0 = scmp.ne.s32.totalorder %s368_s0, %s245_s19  ;;  %s18_s16 = int_to_ptr.vmem [resolvable:$true] %s17_s16 }
   0x3   :  { %p249_p1 = scmp.lt.u32.totalorder %s245_s19, %s368_s0 }
   0x5   :  { %p251_p2 = pnand %p249_p1, %p246_p0 }
   0x7   :  { %254 = shalt.err (!%p251_p2)
}
   0x8   :  { %s255_s24 = scalar_lea.vmem %s18_s16, 128  ;;  %p260_p4 = scmp.lt.s32.totalorder %s18_s16, %s18_s16 }
   0x9   :  { %p256_p3 = scmp.ne.s32.totalorder %s18_s16, %s255_s24  ;;  %p261_p5 = scmp.lt.s32.totalorder %s255_s24, %s255_s24 }
   0xb   :  { %p262_p6 = por %p261_p5, %p260_p4 }
   0xd   :  { %p263_p7 = pnand %p262_p6, %p256_p3 }
   0xf   :  { %266 = shalt.err (!%p263_p7)
}
  0x10   :  { %20 = dma.hbm_to_vmem [thread:$0]  %s368_s0, 128, %s18_s16, [#allocation3]  }
  0x11   :  { %289 = dma.done.wait [#allocation3], 128  }
  0x12   :  { %290 = vsyncadd [#allocation3], 4294967168  ;;  %v294_v0 = vmov 0.0|0.0   ;;  %vm295_vm0 = vmmov 0   ;;  %v296_v1 = vmov 0.0   ;;  %v31_v2 = vld [vmem:[%s370_s2] sm:$0xff] }
  0x13   :  { %233 = vmatprep.subr.bf16.mxu0 %v294_v0  ;;  %230 = vmatprep.subr.bf16.mxu1 %v294_v0  ;;  %v32_v3 = vld [vmem:[%s370_s2 + $0x8] sm:$0xff]  ;;  %v36_v4 = vld [vmem:[%s371_s3] sm:$0xff]  ;;  %v33_v7 = vld [vmem:[%s370_s2 + $0x10] sm:$0xff]  ;;  %vm38_vm1 = vcmask 130048   ;;  %vm112_vm2 = vcmask 261120  }
  0x14   :  { %216 = vmatprep.mubr.msk.f32.mxu1 %vm295_vm0, %v296_v1  ;;  %227 = vmatprep.mubr.msk.f32.mxu0 %vm295_vm0, %v296_v1  ;;  %v234_v5 = vpack.c.bf16 %v32_v3, %v31_v2  ;;  %v37_v6 = vld [vmem:[%s371_s3 + $0x8] sm:$0xff]  ;;  %v34_v8 = vld [vmem:[%s370_s2 + $0x18] sm:$0xff]  ;;  %v35_v11 = vld [vmem:[%s369_s1] sm:$0xff]  ;;  %s297_s3 = smov [#allocation5]  }
  0x15   :  { %v231_v9 = vpack.c.bf16 %v37_v6, %v36_v4  ;;  %v237_v10 = vpack.c.bf16 %v34_v8, %v33_v7  ;;  %v30_v12 = vld [vmem:[#allocation2] sm:$0xff]  ;;  %s193_s14 = sshll.u32 %s297_s3, 4  ;;  %s194_s14 = int_to_ptr.vmem [resolvable:$true] %s193_s14 }
  0x16   :  { %235 = vmatpush3.bf16.msra.mxu0 %v234_v5  ;;  %s267_s2 = scalar_lea.vmem %s194_s14, 128  ;;  %p272_p9 = scmp.lt.s32.totalorder %s194_s14, %s194_s14 }
  0x17   :  { %232 = vmatpush3.bf16.msra.mxu1 %v231_v9  ;;  %236 = vmatprep.subr.bf16.mxu0 %v294_v0  ;;  %p268_p8 = scmp.ne.s32.totalorder %s194_s14, %s267_s2  ;;  %p273_p10 = scmp.lt.s32.totalorder %s267_s2, %s267_s2 }
  0x19   :  { %p274_p11 = por %p273_p10, %p272_p9 }
  0x1a   :  { %238 = vmatpush3.bf16.msra.mxu0 %v237_v10  ;;  %217 = vmatmul.mubr.msk.f32.vlgmr.msra.gmra.mrb[0].mxu1 %vm38_vm1, %v35_v11 }
  0x1b   :  { %p275_p12 = pnand %p274_p11, %p268_p8 }
  0x1d   :  { %228 = vmatmul.mubr.msk.f32.vlgmr.msra.gmra.mrb[0].mxu0 %vm112_vm2, %v30_v12 }
  0xed   :  { %v108_v13 = vpop.f32.mrb[0].mxu1 }
  0xee   :  { %v218_v14 = vpop.f32.mrb[1].mxu1 }
  0xf0   :  { %v182_v15 = vpop.f32.mrb[0].mxu0 }
  0xf1   :  { %v183_v16 = vadd.f32 %v182_v15, %v108_v13  ;;  %v229_v17 = vpop.f32.mrb[1].mxu0 }
  0xf3   :  { %186 = vst.msk [vmem:[#allocation5] sm:$0xff] %vm112_vm2, %v183_v16 }
  0xf4   :  { %278 = shalt.err (!%p275_p12)
}
  0xf5   :  { %s279_s16 = scalar_lea.hbm %s372_s4, 128 }
  0xf6   :  { %p280_p13 = scmp.ne.s32.totalorder %s372_s4, %s279_s16  ;;  %p283_p0 = scmp.lt.u32.totalorder %s279_s16, %s372_s4 }
  0xf8   :  { %p285_p1 = pnand %p283_p0, %p280_p13 }
  0xfa   :  { %288 = shalt.err (!%p285_p1)
}
  0xfb   :  { %196 = dma.vmem_to_hbm [thread:$0]  %s194_s14, 128, %s372_s4, [#allocation4]  }
  0xfc   :  { %291 = dma.done.wait [#allocation4], 128  }
  0xfd   :  { %292 = vsyncadd [#allocation4], 4294967168 }
  0xfe   :  { %200 = vsyncpa [#allocation3], 1 }
  0xff   :  { %201 = vsyncpa [#allocation4], 1 }

</bundles_post_ra>
